<compile_context>
chip_gen: v6e
topology: v6e:2x2x1
jax: 0.10.0
libtpu: 0.0.40
codegen_flags: <defaults>
</compile_context>

<pallas_src>
import jax
import jax.numpy as jnp
from jax import lax
from jax.experimental import pallas as pl
from jax.experimental.pallas import tpu as pltpu


# ----------------------------------------------------------------------------
# Module configuration (Python constants, *not* traced).
# ----------------------------------------------------------------------------
IN_CHANNELS_PREV = 4
IN_CHANNELS = 8
OUT_CHANNELS = 16
USE_BOTTLENECK = True
BOTTLENECK_FACTOR_PREV = 2
BOTTLENECK_FACTOR = 2
# TODO(synk): the use_bottleneck=False variant would simply skip the block-
# diagonal 1x1 stage (a Python-level specialization); only the instantiated
# bottleneck configuration is implemented here.


# ----------------------------------------------------------------------------
# Fused Pallas kernel: whole MSDScaleBlock forward, single invocation, no grid.
# All activations are channels-major (C, N*H*W) -> pixels on the lane axis.
# ----------------------------------------------------------------------------
def _msd_scale_block_kernel(
    x_ref,        # (Cin,       Mc)       current-scale input
    xsp_ref,      # (9*Cprev,   Mp)       3x3 taps of x_prev (k-major, ch-minor)
    xsc_ref,      # (9*Cin,     Mc)       3x3 taps of x
    dw1_ref,      # (9*Cmid_d,  9*Cprev)  block-diag folded 1x1 (down branch)
    db1_ref,      # (9*Cmid_d,  1)
    dw3_ref,      # (Cmid,      9*Cmid_d) folded 3x3 (down), taps flattened
    db3_ref,      # (Cmid,      1)
    cw1_ref,      # (9*Cmid_c,  9*Cin)    block-diag folded 1x1 (curr branch)
    cb1_ref,      # (9*Cmid_c,  1)
    cw3_ref,      # (Cmid,      9*Cmid_c)
    cb3_ref,      # (Cmid,      1)
    maskp_ref,    # (9*Cmid_d,  Mp)       tap validity (zero padding), 0/1
    maskc_ref,    # (9*Cmid_c,  Mc)
    sel_ref,      # (Mp, Mc)              stride-2 column selection, 0/1
    o_ref,        # (Cin + 2*Cmid, Mc)    concatenated output slab
):
    f32 = jnp.float32

    # ---- down branch (previous scale, 3x3 stride 2) -------------------------
    # Bottleneck (1x1 conv + BN + ReLU) applied to all nine shifted taps at
    # once via a block-diagonal weight; the mask re-zeroes padded taps (where
    # ReLU(bias) would otherwise leak a non-zero value).
    a_d = jnp.maximum(
        jnp.dot(dw1_ref[...], xsp_ref[...], preferred_element_type=f32)
        + db1_ref[...], 0.0) * maskp_ref[...]                    # (9*Cmid_d, Mp)
    # 3x3 conv (+ folded BN bias + ReLU) as one matmul over the stacked taps
    # at full resolution ...
    y_d_full = jnp.maximum(
        jnp.dot(dw3_ref[...], a_d, preferred_element_type=f32)
        + db3_ref[...], 0.0)                                     # (Cmid, Mp)
    # ... then the stride-2 downsample as a 0/1 column-selection matmul.
    y_prev = jnp.dot(y_d_full, sel_ref[...], preferred_element_type=f32)

    # ---- current branch (3x3 stride 1) ---------------------------------------
    a_c = jnp.maximum(
        jnp.dot(cw1_ref[...], xsc_ref[...], preferred_element_type=f32)
        + cb1_ref[...], 0.0) * maskc_ref[...]                    # (9*Cmid_c, Mc)
    y_curr = jnp.maximum(
        jnp.dot(cw3_ref[...], a_c, preferred_element_type=f32)
        + cb3_ref[...], 0.0)                                     # (Cmid, Mc)

    # ---- torch.cat((x, y_prev, y), dim=1): write straight into the slab -----
    cin = x_ref.shape[0]
    mid = y_prev.shape[0]
    o_ref[0:cin, :] = x_ref[...]
    o_ref[cin:cin + mid, :] = y_prev
    o_ref[cin + mid:cin + 2 * mid, :] = y_curr


# ----------------------------------------------------------------------------
# Host-side layout helpers (tiny XLA glue around the single kernel call).
# ----------------------------------------------------------------------------
def _to_cm(x_nchw):
    """NCHW -> channels-major matrix (C, N*H*W)."""
    n, c, h, w = x_nchw.shape
    return jnp.transpose(x_nchw, (1, 0, 2, 3)).reshape(c, n * h * w)


def _from_cm(y_cm, n, h, w):
    """(C, N*H*W) -> NCHW."""
    c = y_cm.shape[0]
    return jnp.transpose(y_cm.reshape(c, n, h, w), (1, 0, 2, 3))


def _taps_cm(x_nchw):
    """3x3 zero-padded taps of x as (9*C, N*H*W), rows k-major / channel-minor.
    Row (ky*3+kx)*C + ci, column n*H*W + h*W + w holds x[n, ci, h+ky-1, w+kx-1]
    (0 outside the image)."""
    n, c, h, w = x_nchw.shape
    xp = jnp.pad(x_nchw, ((0, 0), (0, 0), (1, 1), (1, 1)))
    taps = [xp[:, :, ky:ky + h, kx:kx + w]
            for ky in range(3) for kx in range(3)]                # 9x(N,C,H,W)
    t = jnp.transpose(jnp.stack(taps, axis=0), (0, 2, 1, 3, 4))   # (9,C,N,H,W)
    return t.reshape(9 * c, n * h * w)


def _tap_validity_mask(n, h, w, cmid):
    """(9*cmid, n*h*w) f32; 1 where the 3x3 tap lies inside the image."""
    hh = jnp.arange(h)
    ww = jnp.arange(w)
    rows = []
    for ky in range(3):
        for kx in range(3):
            mh = ((hh + ky - 1) >= 0) & ((hh + ky - 1) < h)
            mw = ((ww + kx - 1) >= 0) & ((ww + kx - 1) < w)
            m2 = (mh[:, None] & mw[None, :]).astype(jnp.float32)  # (h, w)
            rows.append(jnp.tile(m2.reshape(-1), n))              # (n*h*w,)
    masks9 = jnp.stack(rows, axis=0)                              # (9, n*h*w)
    return jnp.repeat(masks9, cmid, axis=0)                       # (9*cmid, M)


def _stride2_selection(n, h, w):
    """(n*h*w, n*(h//2)*(w//2)) 0/1 matrix picking the stride-2 output pixels."""
    ho, wo = h // 2, w // 2
    nn = jnp.arange(n)[:, None, None]
    hh = jnp.arange(ho)[None, :, None]
    ww = jnp.arange(wo)[None, None, :]
    src = (nn * (h * w) + (2 * hh) * w + 2 * ww).reshape(-1)      # (n*ho*wo,)
    return (jnp.arange(n * h * w)[:, None] == src[None, :]).astype(jnp.float32)


# ----------------------------------------------------------------------------
# Deterministic parameter init (Conv(bias=False) + BN(eval) folded) and
# rearrangement into the fused-kernel operand layouts.
# ----------------------------------------------------------------------------
def _init_folded_conv(key, cout, cin, ksize):
    k1, k2, k3, k4, k5 = jax.random.split(key, 5)
    w = jax.random.normal(k1, (cout, cin, ksize, ksize), jnp.float32) * 0.1
    gamma = jax.random.uniform(k2, (cout,), jnp.float32, 0.5, 1.5)
    beta = jax.random.normal(k3, (cout,), jnp.float32) * 0.1
    mean = jax.random.normal(k4, (cout,), jnp.float32) * 0.1
    var = jax.random.uniform(k5, (cout,), jnp.float32, 0.5, 1.5)
    scale = gamma / jnp.sqrt(var + 1e-5)
    return w * scale[:, None, None, None], beta - mean * scale


def _prep_base_block(w1, b1, w3, b3):
    """Rearrange one MSDBaseBlock's folded weights into fused-kernel operands."""
    cmid_bn = w1.shape[0]                 # bottleneck output channels
    cout = w3.shape[0]
    return dict(
        w1_bd=jnp.kron(jnp.eye(9, dtype=w1.dtype), w1),   # (9*cmid_bn, 9*cin)
        b1_rep=jnp.tile(b1, 9).reshape(9 * cmid_bn, 1),
        # w3 (cout, cmid_bn, 3, 3) -> (cout, 9*cmid_bn), taps k-major/ch-minor
        w3_flat=jnp.transpose(w3, (0, 2, 3, 1)).reshape(cout, 9 * cmid_bn),
        b3=b3.reshape(cout, 1),
    )


def init_msd_scale_block(key):
    assert OUT_CHANNELS > IN_CHANNELS and OUT_CHANNELS % 2 == 0
    assert USE_BOTTLENECK, "only the bottleneck configuration is implemented"
    mid = (OUT_CHANNELS - IN_CHANNELS) // 2
    mid_d = min(IN_CHANNELS_PREV, BOTTLENECK_FACTOR_PREV * mid)
    mid_c = min(IN_CHANNELS, BOTTLENECK_FACTOR * mid)
    kd1, kd3, kc1, kc3 = jax.random.split(key, 4)
    d_w1, d_b1 = _init_folded_conv(kd1, mid_d, IN_CHANNELS_PREV, 1)
    d_w3, d_b3 = _init_folded_conv(kd3, mid, mid_d, 3)
    c_w1, c_b1 = _init_folded_conv(kc1, mid_c, IN_CHANNELS, 1)
    c_w3, c_b3 = _init_folded_conv(kc3, mid, mid_c, 3)
    # traced params: arrays only (no Python bools -> no TracerBoolConversion)
    params = dict(
        down=_prep_base_block(d_w1[:, :, 0, 0], d_b1, d_w3, d_b3),
        curr=_prep_base_block(c_w1[:, :, 0, 0], c_b1, c_w3, c_b3),
    )
    raw = dict(d_w1=d_w1, d_b1=d_b1, d_w3=d_w3, d_b3=d_b3,
               c_w1=c_w1, c_b1=c_b1, c_w3=c_w3, c_b3=c_b3)
    return params, raw


# ----------------------------------------------------------------------------
# Forward (single fused pallas_call, no grid).
# ----------------------------------------------------------------------------
@jax.jit
def msd_scale_block_forward(x_prev_nchw, x_nchw, params):
    n, _, hp, wp = x_prev_nchw.shape
    _, cin, hc, wc = x_nchw.shape
    mp, mc = n * hp * wp, n * hc * wc
    mid = params["down"]["w3_flat"].shape[0]
    cmid_d = params["down"]["w1_bd"].shape[0] // 9
    cmid_c = params["curr"]["w1_bd"].shape[0] // 9

    x_cm = _to_cm(x_nchw)                             # (Cin, Mc)
    xsp = _taps_cm(x_prev_nchw)                       # (9*Cprev, Mp)
    xsc = _taps_cm(x_nchw)                            # (9*Cin, Mc)
    maskp = _tap_validity_mask(n, hp, wp, cmid_d)     # (9*Cmid_d, Mp)
    maskc = _tap_validity_mask(n, hc, wc, cmid_c)     # (9*Cmid_c, Mc)
    sel = _stride2_selection(n, hp, wp)               # (Mp, Mc)

    pd, pc = params["down"], params["curr"]
    operands = (x_cm, xsp, xsc,
                pd["w1_bd"], pd["b1_rep"], pd["w3_flat"], pd["b3"],
                pc["w1_bd"], pc["b1_rep"], pc["w3_flat"], pc["b3"],
                maskp, maskc, sel)

    out_cm = pl.pallas_call(
        _msd_scale_block_kernel,
        out_shape=jax.ShapeDtypeStruct((cin + 2 * mid, mc), jnp.float32),
        in_specs=[pl.BlockSpec(memory_space=pltpu.MemorySpace.VMEM)]
        * len(operands),
        out_specs=pl.BlockSpec(memory_space=pltpu.MemorySpace.VMEM),
    )(*operands)

    return _from_cm(out_cm, n, hc, wc)                # NCHW (N, Cin+2*mid, hc, wc)


# ----------------------------------------------------------------------------
# Pure-JAX reference (lax.conv, NCHW) to validate the fused Pallas path.
# ----------------------------------------------------------------------------
def _ref_conv_bn_relu(x, w, b, stride, pad):
    y = lax.conv_general_dilated(
        x, w, window_strides=(stride, stride),
        padding=((pad, pad), (pad, pad)),
        dimension_numbers=("NCHW", "OIHW", "NCHW"),
        precision=lax.Precision.HIGHEST)
    return jnp.maximum(y + b.reshape(1, -1, 1, 1), 0.0)


def msd_scale_block_reference(x_prev, x, raw):
    t = _ref_conv_bn_relu(x_prev, raw["d_w1"], raw["d_b1"], 1, 0)
    y_prev = _ref_conv_bn_relu(t, raw["d_w3"], raw["d_b3"], 2, 1)
    t = _ref_conv_bn_relu(x, raw["c_w1"], raw["c_b1"], 1, 0)
    y_curr = _ref_conv_bn_relu(t, raw["c_w3"], raw["c_b3"], 1, 1)
    return jnp.concatenate([x, y_prev, y_curr], axis=1)


# ----------------------------------------------------------------------------
if __name__ == "__main__":
    key = jax.random.PRNGKey(0)
    k_par, k_xp, k_x = jax.random.split(key, 3)
    params, raw = init_msd_scale_block(k_par)

    # x_prev: previous (higher-resolution) scale, x: current scale (NCHW).
    x_prev = jax.random.normal(k_xp, (2, IN_CHANNELS_PREV, 16, 16), jnp.float32)
    x = jax.random.normal(k_x, (2, IN_CHANNELS, 8, 8), jnp.float32)

    out = jax.block_until_ready(msd_scale_block_forward(x_prev, x, params))
    assert out.shape == (2, OUT_CHANNELS, 8, 8), out.shape

    ref = msd_scale_block_reference(x_prev, x, raw)
    max_err = float(jnp.max(jnp.abs(out - ref)))
    # 1e-2 tolerance: the MXU may evaluate f32 matmuls at reduced input
    # precision under default settings; structural errors would be O(0.1+).
    assert max_err < 1e-2, max_err
    print("KERNEL_OK")
</pallas_src>

<mosaic_0001>
module attributes {stable_mosaic.version = 11 : i64} {
  func.func @_msd_scale_block_kernel(%arg0: memref<8x128xf32, #tpu.memory_space<vmem>>, %arg1: memref<36x512xf32, #tpu.memory_space<vmem>>, %arg2: memref<72x128xf32, #tpu.memory_space<vmem>>, %arg3: memref<36x36xf32, #tpu.memory_space<vmem>>, %arg4: memref<36x1xf32, #tpu.memory_space<vmem>>, %arg5: memref<4x36xf32, #tpu.memory_space<vmem>>, %arg6: memref<4x1xf32, #tpu.memory_space<vmem>>, %arg7: memref<72x72xf32, #tpu.memory_space<vmem>>, %arg8: memref<72x1xf32, #tpu.memory_space<vmem>>, %arg9: memref<4x72xf32, #tpu.memory_space<vmem>>, %arg10: memref<4x1xf32, #tpu.memory_space<vmem>>, %arg11: memref<36x512xf32, #tpu.memory_space<vmem>>, %arg12: memref<72x128xf32, #tpu.memory_space<vmem>>, %arg13: memref<512x128xf32, #tpu.memory_space<vmem>>, %arg14: memref<16x128xf32, #tpu.memory_space<vmem>>) attributes {dimension_semantics = [], scalar_prefetch = 0 : i64, scratch_operands = 0 : i64, tpu.core_type = #tpu.core_type<tc>} {
    %c0 = arith.constant 0 : index
    %c0_0 = arith.constant 0 : index
    %0 = vector.load %arg3[%c0, %c0_0] : memref<36x36xf32, #tpu.memory_space<vmem>>, vector<36x36xf32>
    %c0_1 = arith.constant 0 : index
    %c0_2 = arith.constant 0 : index
    %1 = vector.load %arg1[%c0_1, %c0_2] : memref<36x512xf32, #tpu.memory_space<vmem>>, vector<36x512xf32>
    %cst = arith.constant dense<0.000000e+00> : vector<36x512xf32>
    %2 = tpu.matmul %0, %1, %cst {dimension_numbers = #tpu.dot_dimension_numbers<[1], [0], [0], [1], [0, 0, 1, 1], [], []>} : vector<36x36xf32>, vector<36x512xf32>, vector<36x512xf32> -> vector<36x512xf32>
    %c0_3 = arith.constant 0 : index
    %c0_4 = arith.constant 0 : index
    %3 = vector.load %arg4[%c0_3, %c0_4] : memref<36x1xf32, #tpu.memory_space<vmem>>, vector<36x1xf32>
    %4 = vector.broadcast %3 : vector<36x1xf32> to vector<36x512xf32>
    %5 = arith.addf %2, %4 : vector<36x512xf32>
    %cst_5 = arith.constant 0.000000e+00 : f32
    %6 = vector.broadcast %cst_5 : f32 to vector<36x512xf32>
    %7 = arith.maximumf %5, %6 : vector<36x512xf32>
    %c0_6 = arith.constant 0 : index
    %c0_7 = arith.constant 0 : index
    %8 = vector.load %arg11[%c0_6, %c0_7] : memref<36x512xf32, #tpu.memory_space<vmem>>, vector<36x512xf32>
    %9 = arith.mulf %7, %8 : vector<36x512xf32>
    %c0_8 = arith.constant 0 : index
    %c0_9 = arith.constant 0 : index
    %10 = vector.load %arg5[%c0_8, %c0_9] : memref<4x36xf32, #tpu.memory_space<vmem>>, vector<4x36xf32>
    %cst_10 = arith.constant dense<0.000000e+00> : vector<4x512xf32>
    %11 = tpu.matmul %10, %9, %cst_10 {dimension_numbers = #tpu.dot_dimension_numbers<[1], [0], [0], [1], [0, 0, 1, 1], [], []>} : vector<4x36xf32>, vector<36x512xf32>, vector<4x512xf32> -> vector<4x512xf32>
    %c0_11 = arith.constant 0 : index
    %c0_12 = arith.constant 0 : index
    %12 = vector.load %arg6[%c0_11, %c0_12] : memref<4x1xf32, #tpu.memory_space<vmem>>, vector<4x1xf32>
    %13 = vector.broadcast %12 : vector<4x1xf32> to vector<4x512xf32>
    %14 = arith.addf %11, %13 : vector<4x512xf32>
    %cst_13 = arith.constant 0.000000e+00 : f32
    %15 = vector.broadcast %cst_13 : f32 to vector<4x512xf32>
    %16 = arith.maximumf %14, %15 : vector<4x512xf32>
    %c0_14 = arith.constant 0 : index
    %c0_15 = arith.constant 0 : index
    %17 = vector.load %arg13[%c0_14, %c0_15] : memref<512x128xf32, #tpu.memory_space<vmem>>, vector<512x128xf32>
    %cst_16 = arith.constant dense<0.000000e+00> : vector<4x128xf32>
    %18 = tpu.matmul %16, %17, %cst_16 {dimension_numbers = #tpu.dot_dimension_numbers<[1], [0], [0], [1], [0, 0, 1, 1], [], []>} : vector<4x512xf32>, vector<512x128xf32>, vector<4x128xf32> -> vector<4x128xf32>
    %c0_17 = arith.constant 0 : index
    %c0_18 = arith.constant 0 : index
    %19 = vector.load %arg7[%c0_17, %c0_18] : memref<72x72xf32, #tpu.memory_space<vmem>>, vector<72x72xf32>
    %c0_19 = arith.constant 0 : index
    %c0_20 = arith.constant 0 : index
    %20 = vector.load %arg2[%c0_19, %c0_20] : memref<72x128xf32, #tpu.memory_space<vmem>>, vector<72x128xf32>
    %cst_21 = arith.constant dense<0.000000e+00> : vector<72x128xf32>
    %21 = tpu.matmul %19, %20, %cst_21 {dimension_numbers = #tpu.dot_dimension_numbers<[1], [0], [0], [1], [0, 0, 1, 1], [], []>} : vector<72x72xf32>, vector<72x128xf32>, vector<72x128xf32> -> vector<72x128xf32>
    %c0_22 = arith.constant 0 : index
    %c0_23 = arith.constant 0 : index
    %22 = vector.load %arg8[%c0_22, %c0_23] : memref<72x1xf32, #tpu.memory_space<vmem>>, vector<72x1xf32>
    %23 = vector.broadcast %22 : vector<72x1xf32> to vector<72x128xf32>
    %24 = arith.addf %21, %23 : vector<72x128xf32>
    %cst_24 = arith.constant 0.000000e+00 : f32
    %25 = vector.broadcast %cst_24 : f32 to vector<72x128xf32>
    %26 = arith.maximumf %24, %25 : vector<72x128xf32>
    %c0_25 = arith.constant 0 : index
    %c0_26 = arith.constant 0 : index
    %27 = vector.load %arg12[%c0_25, %c0_26] : memref<72x128xf32, #tpu.memory_space<vmem>>, vector<72x128xf32>
    %28 = arith.mulf %26, %27 : vector<72x128xf32>
    %c0_27 = arith.constant 0 : index
    %c0_28 = arith.constant 0 : index
    %29 = vector.load %arg9[%c0_27, %c0_28] : memref<4x72xf32, #tpu.memory_space<vmem>>, vector<4x72xf32>
    %cst_29 = arith.constant dense<0.000000e+00> : vector<4x128xf32>
    %30 = tpu.matmul %29, %28, %cst_29 {dimension_numbers = #tpu.dot_dimension_numbers<[1], [0], [0], [1], [0, 0, 1, 1], [], []>} : vector<4x72xf32>, vector<72x128xf32>, vector<4x128xf32> -> vector<4x128xf32>
    %c0_30 = arith.constant 0 : index
    %c0_31 = arith.constant 0 : index
    %31 = vector.load %arg10[%c0_30, %c0_31] : memref<4x1xf32, #tpu.memory_space<vmem>>, vector<4x1xf32>
    %32 = vector.broadcast %31 : vector<4x1xf32> to vector<4x128xf32>
    %33 = arith.addf %30, %32 : vector<4x128xf32>
    %cst_32 = arith.constant 0.000000e+00 : f32
    %34 = vector.broadcast %cst_32 : f32 to vector<4x128xf32>
    %35 = arith.maximumf %33, %34 : vector<4x128xf32>
    %c0_33 = arith.constant 0 : index
    %c0_34 = arith.constant 0 : index
    %36 = vector.load %arg0[%c0_33, %c0_34] : memref<8x128xf32, #tpu.memory_space<vmem>>, vector<8x128xf32>
    %c0_35 = arith.constant 0 : index
    %c0_36 = arith.constant 0 : index
    %37 = vector.load %arg14[%c0_35, %c0_36] : memref<16x128xf32, #tpu.memory_space<vmem>>, vector<8x128xf32>
    tpu.vector_store %arg14[%c0_35, %c0_36], %36 {strides = array<i32>} : memref<16x128xf32, #tpu.memory_space<vmem>>, vector<8x128xf32>,
    %c8 = arith.constant 8 : index
    %c0_37 = arith.constant 0 : index
    %38 = vector.load %arg14[%c8, %c0_37] : memref<16x128xf32, #tpu.memory_space<vmem>>, vector<4x128xf32>
    tpu.vector_store %arg14[%c8, %c0_37], %18 {strides = array<i32>} : memref<16x128xf32, #tpu.memory_space<vmem>>, vector<4x128xf32>,
    %c12 = arith.constant 12 : index
    %c0_38 = arith.constant 0 : index
    %39 = vector.load %arg14[%c12, %c0_38] : memref<16x128xf32, #tpu.memory_space<vmem>>, vector<4x128xf32>
    tpu.vector_store %arg14[%c12, %c0_38], %35 {strides = array<i32>} : memref<16x128xf32, #tpu.memory_space<vmem>>, vector<4x128xf32>,
    return
  }
}

</mosaic_0001>

<bundles_post_ra>
// kernel: tile.110
= control target key start
LH: loop header
LB: loop body
LE: loop exit
PB: predicated region body
PF: predicated region fallthrough
CT: control target
= control target key end

     0   :  { %s22_s0 = inlined_call_operand.vmem [shape: f32[64], index: 0, kind: input, shape index: {}]   ;;  %s23_s1 = inlined_call_operand.vmem [shape: f32[2,64], index: 1, kind: output, shape index: {}]  }
   0x1   :  { %v4_v0 = vld [vmem:[%s22_s0] ss:$0 sm:$0xff] }
   0x2   :  { %5 = vst [vmem:[%s23_s1] sm:$0x3] %v4_v0 }

// kernel: tile.135
= control target key start
LH: loop header
LB: loop body
LE: loop exit
PB: predicated region body
PF: predicated region fallthrough
CT: control target
= control target key end

     0   :  { %vm8_vm0 = vcmask 523264   ;;  %vm14_vm1 = vcmask 1048064   ;;  %s42_s0 = inlined_call_operand.vmem [shape: f32[2,64], index: 0, kind: input, shape index: {}]   ;;  %s43_s1 = inlined_call_operand.vmem [shape: f32[1,128], index: 1, kind: output, shape index: {}]  }
   0x1   :  { %v5_v0 = vld [vmem:[%s42_s0] sm:$0x3]  ;;  %s25_s0 = smov 64  }
   0x2   :  { %6 = vst [vmem:[#allocation1] sm:$0x3] %v5_v0 }
   0x9   :  { %v11_v1 = vld [vmem:[#allocation1 + $0x1] sm:$0x1]   ;;  %v7_v2 = vld [vmem:[#allocation1] sm:$0x1]  }
   0xa   :  { %12 = vrot.lane.b32.xlu0 %v11_v1, %s25_s0  ;;  %9 = vst.msk [vmem:[#allocation0] sm:$0x1] %vm8_vm0, %v7_v2  }
  0x7c   :  { %v13_v3 = vpop.permute.xlu0 %12  }
  0x7d   :  { %15 = vst.msk [vmem:[#allocation0] sm:$0x1] %vm14_vm1, %v13_v3  }
  0x84   :  { %v20_v4 = vld [vmem:[#allocation0] sm:$0x1] }
  0x85   :  { %23 = vst [vmem:[%s43_s1] sm:$0x1] %v20_v4 }

// kernel: msd_scale_block_forward.1
= control target key start
LH: loop header
LB: loop body
LE: loop exit
PB: predicated region body
PF: predicated region fallthrough
CT: control target
= control target key end

     0   :  { %vm118_vm0 = vcmask 1043456   ;;  %v1278_v3 = vmov 0.0   ;;  %vm102_vm1 = vcmask 293888   ;;  %v1279_v25 = vmov 0   ;;  %s1925_s1 = inlined_call_operand.vmem [shape: f32[36,512], index: 1, kind: input, shape index: {}]   ;;  %s1926_s3 = inlined_call_operand.vmem [shape: f32[36,36], index: 3, kind: input, shape index: {}]   ;;  %s1927_s4 = inlined_call_operand.vmem [shape: f32[36,1], index: 4, kind: input, shape index: {}]   ;;  %s1928_s6 = inlined_call_operand.vmem [shape: f32[4,1], index: 6, kind: input, shape index: {}]   ;;  %s1929_s8 = inlined_call_operand.vmem [shape: f32[72,1], index: 8, kind: input, shape index: {}]   ;;  %s1930_s10 = inlined_call_operand.vmem [shape: f32[4,1], index: 10, kind: input, shape index: {}]   ;;  %s1931_s13 = inlined_call_operand.vmem [shape: f32[512,128], index: 13, kind: input, shape index: {}]   ;;  %s1932_s11 = inlined_call_operand.vmem [shape: f32[36,512], index: 11, kind: input, shape index: {}]   ;;  %s1933_s5 = inlined_call_operand.vmem [shape: f32[4,36], index: 5, kind: input, shape index: {}]   ;;  %s1934_s2 = inlined_call_operand.vmem [shape: f32[72,128], index: 2, kind: input, shape index: {}]   ;;  %s1935_s7 = inlined_call_operand.vmem [shape: f32[72,72], index: 7, kind: input, shape index: {}]   ;;  %s1936_s0 = inlined_call_operand.vmem [shape: f32[8,128], index: 0, kind: input, shape index: {}]   ;;  %s1937_s14 = inlined_call_operand.vmem [shape: f32[16,128], index: 14, kind: output, shape index: {}]   ;;  %s1938_s12 = inlined_call_operand.vmem [shape: f32[72,128], index: 12, kind: input, shape index: {}]   ;;  %s1939_s9 = inlined_call_operand.vmem [shape: f32[4,72], index: 9, kind: input, shape index: {}]  }
   0x1   :  { %v69_v0 = vld [vmem:[%s1925_s1 + $0x88] sm:$0xf]  ;;  %v71_v1 = vld [vmem:[%s1925_s1 + $0x98] sm:$0xf]  ;;  %v68_v2 = vld [vmem:[%s1925_s1 + $0x80] sm:$0xf]  ;;  %195 = vmatprep.mubr.f32.mxu0 %v1278_v3  ;;  %290 = vmatprep.mubr.f32.mxu1 %v1278_v3 }
   0x2   :  { %1079 = vmatprep.subr.msk.mxu0 %vm118_vm0, %v69_v0  ;;  %1086 = vmatprep.subr.msk.mxu1 %vm118_vm0, %v71_v1  ;;  %v70_v4 = vld [vmem:[%s1925_s1 + $0x90] sm:$0xf]  ;;  %v65_v5 = vld [vmem:[%s1925_s1 + $0x68] sm:$0xff]  ;;  %v67_v6 = vld [vmem:[%s1925_s1 + $0x78] sm:$0xff]  ;;  %vm1280_vm2 = vmmov 0   ;;  %vm825_vm3 = vcmask 588800  }
   0x3   :  { %1080 = vmatpush1.msk.msra.mxu0 %vm118_vm0, %v68_v2  ;;  %1087 = vmatpush1.msk.msra.mxu1 %vm118_vm0, %v70_v4  ;;  %v64_v7 = vld [vmem:[%s1925_s1 + $0x60] sm:$0xff]  ;;  %v66_v8 = vld [vmem:[%s1925_s1 + $0x70] sm:$0xff]  ;;  %v61_v9 = vld [vmem:[%s1925_s1 + $0x48] sm:$0xff] }
   0x4   :  { %155 = vmatprep.subr.mxu0 %v65_v5  ;;  %250 = vmatprep.subr.mxu1 %v67_v6  ;;  %v63_v10 = vld [vmem:[%s1925_s1 + $0x58] sm:$0xff]  ;;  %v60_v11 = vld [vmem:[%s1925_s1 + $0x40] sm:$0xff]  ;;  %v62_v12 = vld [vmem:[%s1925_s1 + $0x50] sm:$0xff] }
   0x5   :  { %156 = vmatpush1.msra.mxu0 %v64_v7  ;;  %251 = vmatpush1.msra.mxu1 %v66_v8  ;;  %v57_v13 = vld [vmem:[%s1925_s1 + $0x28] sm:$0xff]  ;;  %v59_v14 = vld [vmem:[%s1925_s1 + $0x38] sm:$0xff]  ;;  %v56_v15 = vld [vmem:[%s1925_s1 + $0x20] sm:$0xff] }
   0x6   :  { %157 = vmatprep.subr.mxu0 %v61_v9  ;;  %252 = vmatprep.subr.mxu1 %v63_v10  ;;  %v58_v16 = vld [vmem:[%s1925_s1 + $0x30] sm:$0xff]  ;;  %v53_v17 = vld [vmem:[%s1925_s1 + $0x8] sm:$0xff]  ;;  %v55_v18 = vld [vmem:[%s1925_s1 + $0x18] sm:$0xff] }
   0x7   :  { %158 = vmatpush1.msra.mxu0 %v60_v11  ;;  %253 = vmatpush1.msra.mxu1 %v62_v12  ;;  %v52_v19 = vld [vmem:[%s1925_s1] sm:$0xff]  ;;  %v54_v20 = vld [vmem:[%s1925_s1 + $0x10] sm:$0xff]  ;;  %v48_v24 = vld [vmem:[%s1926_s3 + $0x8] sm:$0xff] }
   0x8   :  { %159 = vmatprep.subr.mxu0 %v57_v13  ;;  %254 = vmatprep.subr.mxu1 %v59_v14  ;;  %v47_v21 = vld [vmem:[%s1926_s3] sm:$0xff]  ;;  %v74_v23 = vld [vmem:[%s1927_s4 + $0x10] sm:$0xff]  ;;  %v75_v26 = vld [vmem:[%s1927_s4 + $0x18] sm:$0xff] }
   0x9   :  { %160 = vmatpush1.msra.mxu0 %v56_v15  ;;  %255 = vmatpush1.msra.mxu1 %v58_v16  ;;  %v76_v22 = vld [vmem:[%s1927_s4 + $0x20] sm:$0xf]  ;;  %v73_v27 = vld [vmem:[%s1927_s4 + $0x8] sm:$0xff]  ;;  %v49_v28 = vld [vmem:[%s1926_s3 + $0x10] sm:$0xff] }
   0xa   :  { %161 = vmatprep.subr.mxu0 %v53_v17  ;;  %256 = vmatprep.subr.mxu1 %v55_v18  ;;  %v72_v29 = vld [vmem:[%s1927_s4] sm:$0xff]  ;;  %v50_v31 = vld [vmem:[%s1926_s3 + $0x18] sm:$0xff]  ;;  %v777_v35 = vld [vmem:[%s1929_s8 + $0x30] sm:$0xff] }
   0xb   :  { %162 = vmatpush1.msra.mxu0 %v52_v19  ;;  %257 = vmatpush1.msra.mxu1 %v54_v20  ;;  %v382_v30 = vld [vmem:[%s1928_s6] sm:$0xf]  ;;  %v778_v33 = vld [vmem:[%s1929_s8 + $0x38] sm:$0xff]  ;;  %v776_v36 = vld [vmem:[%s1929_s8 + $0x28] sm:$0xff] }
   0xc   :  { %1081 = vmatmul.mubr.msk.f32.vlgmr.msra.gmra.mxu0 %vm102_vm1, %v47_v21  ;;  %1088 = vmatmul.mubr.msk.f32.vlgmr.msra.gmra.mxu1 %vm102_vm1, %v47_v21  ;;  %v779_v32 = vld [vmem:[%s1929_s8 + $0x40] sm:$0xff]  ;;  %v774_v38 = vld [vmem:[%s1929_s8 + $0x18] sm:$0xff]  ;;  %v773_v39 = vld [vmem:[%s1929_s8 + $0x10] sm:$0xff] }
   0xd   :  { %201 = vmatprep.mubr.f32.mxu0 %v1278_v3  ;;  %296 = vmatprep.mubr.f32.mxu1 %v1278_v3  ;;  %v51_v34 = vld [vmem:[%s1926_s3 + $0x20] sm:$0xf]  ;;  %v772_v40 = vld [vmem:[%s1929_s8 + $0x8] sm:$0xff]  ;;  %v580_v43 = vld [vmem:[%s1931_s13 + $0xf8] sm:$0xff] }
   0xe   :  { %1276 = vset.pattern.permute.xlu0 %v1279_v25  ;;  %1277 = vset.pattern.permute.xlu1 %v1279_v25  ;;  %v775_v37 = vld [vmem:[%s1929_s8 + $0x20] sm:$0xff]  ;;  %v564_v44 = vld [vmem:[%s1931_s13 + $0x78] sm:$0xff]  ;;  %v579_v45 = vld [vmem:[%s1931_s13 + $0xf0] sm:$0xff] }
   0xf   :  { %99 = vperm.xlu0 %1276, %v76_v22   ;;  %89 = vperm.xlu1 %1277, %v74_v23   ;;  %v771_v41 = vld [vmem:[%s1929_s8] sm:$0xff]  ;;  %v563_v46 = vld [vmem:[%s1931_s13 + $0x70] sm:$0xff]  ;;  %v578_v47 = vld [vmem:[%s1931_s13 + $0xe8] sm:$0xff] }
  0x10   :  { %1082 = vmatmul.mubr.msk.f32.gmra.mxu0 %vm102_vm1, %v48_v24  ;;  %1089 = vmatmul.mubr.msk.f32.gmra.mxu1 %vm102_vm1, %v48_v24  ;;  %v991_v42 = vld [vmem:[%s1930_s10] sm:$0xf]  ;;  %v562_v48 = vld [vmem:[%s1931_s13 + $0x68] sm:$0xff]  ;;  %v576_v51 = vld [vmem:[%s1931_s13 + $0xd8] sm:$0xff] }
  0x11   :  { %207 = vmatprep.mubr.f32.mxu0 %v1278_v3  ;;  %302 = vmatprep.mubr.f32.mxu1 %v1278_v3  ;;  %v577_v49 = vld [vmem:[%s1931_s13 + $0xe0] sm:$0xff]  ;;  %v560_v52 = vld [vmem:[%s1931_s13 + $0x58] sm:$0xff]  ;;  %v575_v53 = vld [vmem:[%s1931_s13 + $0xd0] sm:$0xff] }
  0x12   :  { %1109 = vmatprep.subr.mxu0 %v580_v43  ;;  %v561_v50 = vld [vmem:[%s1931_s13 + $0x60] sm:$0xff]  ;;  %v559_v54 = vld [vmem:[%s1931_s13 + $0x50] sm:$0xff]  ;;  %v574_v55 = vld [vmem:[%s1931_s13 + $0xc8] sm:$0xff] }
  0x13   :  { %94 = vperm.xlu0 %1276, %v75_v26   ;;  %84 = vperm.xlu1 %1277, %v73_v27   ;;  %v558_v56 = vld [vmem:[%s1931_s13 + $0x48] sm:$0xff]  ;;  %v573_v57 = vld [vmem:[%s1931_s13 + $0xc0] sm:$0xff]  ;;  %v572_v59 = vld [vmem:[%s1931_s13 + $0xb8] sm:$0xff] }
  0x14   :  { %1083 = vmatmul.mubr.msk.f32.gmra.mxu0 %vm102_vm1, %v49_v28  ;;  %1090 = vmatmul.mubr.msk.f32.gmra.mxu1 %vm102_vm1, %v49_v28  ;;  %v557_v58 = vld [vmem:[%s1931_s13 + $0x40] sm:$0xff]  ;;  %v556_v60 = vld [vmem:[%s1931_s13 + $0x38] sm:$0xff]  ;;  %v571_v61 = vld [vmem:[%s1931_s13 + $0xb0] sm:$0xff] }
  0x15   :  { %213 = vmatprep.mubr.f32.mxu0 %v1278_v3  ;;  %308 = vmatprep.mubr.f32.mxu1 %v1278_v3  ;;  %v555_v62 = vld [vmem:[%s1931_s13 + $0x30] sm:$0xff]  ;;  %v570_v63 = vld [vmem:[%s1931_s13 + $0xa8] sm:$0xff]  ;;  %v569_v1 = vld [vmem:[%s1931_s13 + $0xa0] sm:$0xff] }
  0x16   :  { %1110 = vmatpush3.msra.mxu0 %v564_v44  ;;  %v554_v0 = vld [vmem:[%s1931_s13 + $0x28] sm:$0xff]  ;;  %v553_v2 = vld [vmem:[%s1931_s13 + $0x20] sm:$0xff]  ;;  %v568_v4 = vld [vmem:[%s1931_s13 + $0x98] sm:$0xff] }
  0x17   :  { %79 = vperm.xlu0 %1276, %v72_v29   ;;  %385 = vperm.xlu1 %1277, %v382_v30   ;;  %v354_v43 = vld [vmem:[%s1932_s11 + $0x68] sm:$0xff] }
  0x18   :  { %1084 = vmatmul.mubr.msk.f32.gmra.mxu0 %vm102_vm1, %v50_v31  ;;  %1091 = vmatmul.mubr.msk.f32.gmra.mxu1 %vm102_vm1, %v50_v31 }
  0x19   :  { %219 = vmatprep.mubr.f32.mxu0 %v1278_v3  ;;  %314 = vmatprep.mubr.f32.mxu1 %v1278_v3 }
  0x1a   :  { %1111 = vmatprep.subr.mxu0 %v579_v45 }
  0x1b   :  { %822 = vperm.xlu0 %1276, %v779_v32   ;;  %817 = vperm.xlu1 %1277, %v778_v33  }
  0x1c   :  { %1085 = vmatmul.mubr.msk.f32.gmra.mxu0 %vm102_vm1, %v51_v34  ;;  %1092 = vmatmul.mubr.msk.f32.gmra.mxu1 %vm102_vm1, %v51_v34 }
  0x1d   :  { %467 = vmatprep.mubr.f32.mxu1 %v1278_v3  ;;  %1112 = vmatpush3.msra.mxu0 %v563_v46 }
  0x1e   :  { %1113 = vmatprep.subr.mxu0 %v578_v47  ;;  %v353_v47 = vld [vmem:[%s1932_s11 + $0x60] sm:$0xff] }
  0x1f   :  { %812 = vperm.xlu0 %1276, %v777_v35   ;;  %807 = vperm.xlu1 %1277, %v776_v36   ;;  %v358_v35 = vld [vmem:[%s1932_s11 + $0x88] sm:$0xf] }
  0x20   :  { %1114 = vmatpush3.msra.mxu0 %v562_v48 }
  0x21   :  { %1115 = vmatprep.subr.mxu0 %v577_v49 }
  0x22   :  { %1116 = vmatpush3.msra.mxu0 %v561_v50 }
  0x23   :  { %802 = vperm.xlu0 %1276, %v775_v37   ;;  %797 = vperm.xlu1 %1277, %v774_v38   ;;  %v357_v38 = vld [vmem:[%s1932_s11 + $0x80] sm:$0xf] }
  0x24   :  { %1117 = vmatprep.subr.mxu0 %v576_v51  ;;  %v350_v51 = vld [vmem:[%s1932_s11 + $0x48] sm:$0xff] }
  0x25   :  { %1118 = vmatpush3.msra.mxu0 %v560_v52 }
  0x26   :  { %1119 = vmatprep.subr.mxu0 %v575_v53 }
  0x27   :  { %792 = vperm.xlu0 %1276, %v773_v39   ;;  %787 = vperm.xlu1 %1277, %v772_v40  }
  0x28   :  { %1120 = vmatpush3.msra.mxu0 %v559_v54  ;;  %v349_v54 = vld [vmem:[%s1932_s11 + $0x40] sm:$0xff] }
  0x29   :  { %1121 = vmatprep.subr.mxu0 %v574_v55 }
  0x2a   :  { %1122 = vmatpush3.msra.mxu0 %v558_v56 }
  0x2b   :  { %782 = vperm.xlu0 %1276, %v771_v41   ;;  %994 = vperm.xlu1 %1277, %v991_v42  }
  0x2c   :  { %1123 = vmatprep.subr.mxu0 %v573_v57 }
  0x2d   :  { %1124 = vmatpush3.msra.mxu0 %v557_v58  ;;  %v346_v58 = vld [vmem:[%s1932_s11 + $0x28] sm:$0xff] }
  0x2e   :  { %1125 = vmatprep.subr.mxu0 %v572_v59 }
  0x2f   :  { %1126 = vmatpush3.msra.mxu0 %v556_v60 }
  0x30   :  { %1127 = vmatprep.subr.mxu0 %v571_v61 }
  0x31   :  { %1128 = vmatpush3.msra.mxu0 %v555_v62  ;;  %v345_v62 = vld [vmem:[%s1932_s11 + $0x20] sm:$0xff] }
  0x32   :  { %1129 = vmatprep.subr.mxu0 %v570_v63 }
  0x33   :  { %1130 = vmatpush3.msra.mxu0 %v554_v0 }
  0x34   :  { %1131 = vmatprep.subr.mxu0 %v569_v1 }
  0x35   :  { %1132 = vmatpush3.msra.mxu0 %v553_v2  ;;  %v342_v2 = vld [vmem:[%s1932_s11 + $0x8] sm:$0xff] }
  0x36   :  { %1133 = vmatprep.subr.mxu0 %v568_v4 }
  0x8a   :  { %v100_v15 = vpop.permute.xlu0 %99  ;;  %v90_v20 = vpop.permute.xlu1 %89 }
  0x8e   :  { %v95_v23 = vpop.permute.xlu0 %94  ;;  %v85_v32 = vpop.permute.xlu1 %84 }
  0x92   :  { %v80_v40 = vpop.permute.xlu0 %79 }
  0xcc   :  { %v197_v5 = vpop.f32.mrf.mxu0  ;;  %v1579_v6 = vpop.f32.mrf.mxu1 }
  0xcd   :  { %v198_v49 = vadd.f32 %v197_v5, %v80_v40 }
  0xce   :  { %v199_v7 = vpop.f32.mrf.mxu0  ;;  %v1581_v8 = vpop.f32.mrf.mxu1 }
  0xcf   :  { %v200_v45 = vadd.f32 %v199_v7, %v80_v40  ;;  %v321_v1 = vmax.f32 %v198_v49, 0.0  ;;  %v341_v7 = vld [vmem:[%s1932_s11] sm:$0xff]  ;;  %v596_v49 = vld [vmem:[%s1931_s13 + $0x178] sm:$0xff] }
  0xd0   :  { %v203_v9 = vpop.f32.mrf.mxu0  ;;  %v1583_v10 = vpop.f32.mrf.mxu1 }
  0xd1   :  { %v204_v41 = vadd.f32 %v203_v9, %v85_v32  ;;  %v322_v61 = vmax.f32 %v200_v45, 0.0 }
  0xd2   :  { %v205_v11 = vpop.f32.mrf.mxu0  ;;  %v1585_v12 = vpop.f32.mrf.mxu1 }
  0xd3   :  { %v206_v36 = vadd.f32 %v205_v11, %v85_v32  ;;  %v325_v57 = vmax.f32 %v204_v41, 0.0  ;;  %v344_v41 = vld [vmem:[%s1932_s11 + $0x18] sm:$0xff] }
  0xd4   :  { %v209_v13 = vpop.f32.mrf.mxu0  ;;  %v1587_v14 = vpop.f32.mrf.mxu1 }
  0xd5   :  { %v210_v33 = vadd.f32 %v209_v13, %v90_v20  ;;  %v326_v53 = vmax.f32 %v206_v36, 0.0 }
  0xd6   :  { %v211_v16 = vpop.f32.mrf.mxu0  ;;  %v306_v17 = vpop.f32.mrf.mxu1 }
  0xd7   :  { %v212_v30 = vadd.f32 %v211_v16, %v90_v20  ;;  %v329_v50 = vmax.f32 %v210_v33, 0.0  ;;  %v366_v9 = vmul.f32 %v346_v58, %v326_v53  ;;  %v307_v11 = vadd.f32 %v306_v17, %v90_v20  ;;  %v594_v53 = vld [vmem:[%s1931_s13 + $0x168] sm:$0xff]  ;;  %v607_v58 = vld [vmem:[%s1931_s13 + $0x1d0] sm:$0xff] }
  0xd8   :  { %v215_v18 = vpop.f32.mrf.mxu0  ;;  %v310_v19 = vpop.f32.mrf.mxu1  ;;  %v305_v16 = vadd.f32 %v1587_v14, %v90_v20  ;;  %v361_v17 = vmul.f32 %v341_v7, %v321_v1  ;;  %v356_v14 = vld [vmem:[%s1932_s11 + $0x78] sm:$0xff]  ;;  %v381_v20 = vld [vmem:[%s1933_s5] sm:$0xf] }
  0xd9   :  { %v216_v26 = vadd.f32 %v215_v18, %v95_v23  ;;  %v330_v46 = vmax.f32 %v212_v30, 0.0  ;;  %v369_v4 = vmul.f32 %v349_v54, %v329_v50  ;;  %v311_v5 = vadd.f32 %v310_v19, %v95_v23  ;;  %v611_v50 = vld [vmem:[%s1931_s13 + $0x1f0] sm:$0xff]  ;;  %v609_v54 = vld [vmem:[%s1931_s13 + $0x1e0] sm:$0xff]  ;;  %v588_v7 = vld [vmem:[%s1931_s13 + $0x138] sm:$0xff] }
  0xda   :  { %v217_v21 = vpop.f32.mrf.mxu0  ;;  %v312_v22 = vpop.f32.mrf.mxu1  ;;  %v301_v19 = vadd.f32 %v1585_v12, %v85_v32  ;;  %v295_v12 = vadd.f32 %v1581_v8, %v80_v40  ;;  %v331_v30 = vmax.f32 %v305_v16, 0.0  ;;  %v351_v8 = vld [vmem:[%s1932_s11 + $0x50] sm:$0xff]  ;;  %v589_v1 = vld [vmem:[%s1931_s13 + $0x140] sm:$0xff] }
  0xdb   :  { %v218_v25 = vadd.f32 %v217_v21, %v95_v23  ;;  %v333_v42 = vmax.f32 %v216_v26, 0.0  ;;  %v370_v63 = vmul.f32 %v350_v51, %v330_v46  ;;  %v313_v0 = vadd.f32 %v312_v22, %v95_v23  ;;  %v360_v21 = vld [vmem:[%s1932_s11 + $0x98] sm:$0xf]  ;;  %v595_v51 = vld [vmem:[%s1931_s13 + $0x170] sm:$0xff]  ;;  %v549_v16 = vld [vmem:[%s1931_s13] sm:$0xff] }
  0xdc   :  { %v221_v24 = vpop.f32.mrf.mxu0  ;;  %v316_v28 = vpop.f32.mrf.mxu1  ;;  %v362_v22 = vmul.f32 %v342_v2, %v322_v61  ;;  %v335_v26 = vmax.f32 %v311_v5, 0.0  ;;  %v328_v33 = vmax.f32 %v301_v19, 0.0  ;;  %v590_v61 = vld [vmem:[%s1931_s13 + $0x148] sm:$0xff]  ;;  %v551_v2 = vld [vmem:[%s1931_s13 + $0x10] sm:$0xff]  ;;  %v585_v19 = vld [vmem:[%s1931_s13 + $0x120] sm:$0xff] }
  0xdd   :  { %v222_v27 = vadd.f32 %v221_v24, %v100_v15  ;;  %v334_v37 = vmax.f32 %v218_v25, 0.0  ;;  %v373_v59 = vmul.f32 %v353_v47, %v333_v42  ;;  %v317_v60 = vadd.f32 %v316_v28, %v100_v15  ;;  %v359_v24 = vld [vmem:[%s1932_s11 + $0x90] sm:$0xf]  ;;  %v566_v5 = vld [vmem:[%s1931_s13 + $0x88] sm:$0xff] }
  0xde   :  { %v223_v29 = vpop.f32.mrf.mxu0  ;;  %v318_v44 = vpop.f32.mrf.mxu1  ;;  %v336_v23 = vmax.f32 %v313_v0, 0.0  ;;  %v299_v25 = vadd.f32 %v1583_v10, %v85_v32  ;;  %v355_v28 = vld [vmem:[%s1932_s11 + $0x70] sm:$0xff]  ;;  %v293_v10 = vadd.f32 %v1579_v6, %v80_v40  ;;  %v348_v6 = vld [vmem:[%s1932_s11 + $0x38] sm:$0xff]  ;;  %v371_v42 = vmul.f32 %v351_v8, %v331_v30 }
  0xdf   :  { %v224_v31 = vadd.f32 %v223_v29, %v100_v15  ;;  %v337_v34 = vmax.f32 %v222_v27, 0.0  ;;  %v374_v55 = vmul.f32 %v354_v43, %v334_v37  ;;  %v319_v56 = vadd.f32 %v318_v44, %v100_v15  ;;  %v343_v43 = vld [vmem:[%s1932_s11 + $0x10] sm:$0xff]  ;;  %v769_v8 = vld [vmem:[%s1934_s2 + $0x38] sm:$0xff] }
  0xe0   :  { %v365_v15 = vmul.f32 %v345_v62, %v325_v57  ;;  %v339_v18 = vmax.f32 %v317_v60, 0.0  ;;  %v332_v27 = vmax.f32 %v307_v11, 0.0  ;;  %v375_v36 = vmul.f32 %v355_v28, %v335_v26  ;;  %v592_v57 = vld [vmem:[%s1931_s13 + $0x158] sm:$0xff]  ;;  %v606_v60 = vld [vmem:[%s1931_s13 + $0x1c8] sm:$0xff]  ;;  %v567_v0 = vld [vmem:[%s1931_s13 + $0x90] sm:$0xff]  ;;  %v386_v28 = vpop.permute.xlu1 %385 }
  0xe1   :  { %v338_v39 = vmax.f32 %v224_v31, 0.0  ;;  %v377_v52 = vmul.f32 %v357_v38, %v337_v34  ;;  %v340_v13 = vmax.f32 %v319_v56, 0.0  ;;  %v352_v31 = vld [vmem:[%s1932_s11 + $0x58] sm:$0xff]  ;;  %v376_v34 = vmul.f32 %v356_v14, %v336_v23  ;;  %v347_v38 = vld [vmem:[%s1932_s11 + $0x30] sm:$0xff]  ;;  %v598_v26 = vld [vmem:[%s1931_s13 + $0x188] sm:$0xff] }
  0xe2   :  { %v379_v32 = vmul.f32 %v359_v24, %v339_v18  ;;  %v324_v37 = vmax.f32 %v295_v12, 0.0  ;;  %v323_v40 = vmax.f32 %v293_v10, 0.0  ;;  %v368_v44 = vmul.f32 %v348_v6, %v328_v33  ;;  %v608_v56 = vld [vmem:[%s1931_s13 + $0x1d8] sm:$0xff]  ;;  %v603_v11 = vld [vmem:[%s1931_s13 + $0x1b0] sm:$0xff]  ;;  %v602_v18 = vld [vmem:[%s1931_s13 + $0x1a8] sm:$0xff] }
  0xe3   :  { %v378_v48 = vmul.f32 %v358_v35, %v338_v39  ;;  %v380_v29 = vmul.f32 %v360_v21, %v340_v13  ;;  %v327_v35 = vmax.f32 %v299_v25, 0.0  ;;  %v372_v39 = vmul.f32 %v352_v31, %v332_v27  ;;  %v552_v62 = vld [vmem:[%s1931_s13 + $0x18] sm:$0xff]  ;;  %v565_v13 = vld [vmem:[%s1931_s13 + $0x80] sm:$0xff]  ;;  %v586_v21 = vld [vmem:[%s1931_s13 + $0x128] sm:$0xff] }
  0xe4   :  { %v364_v46 = vmul.f32 %v344_v41, %v324_v37  ;;  %v363_v47 = vmul.f32 %v343_v43, %v323_v40  ;;  %1134 = vmatpush3.msra.mxu0 %v552_v62  ;;  %v600_v23 = vld [vmem:[%s1931_s13 + $0x198] sm:$0xff]  ;;  %v583_v25 = vld [vmem:[%s1931_s13 + $0x110] sm:$0xff]  ;;  %v582_v14 = vld [vmem:[%s1931_s13 + $0x108] sm:$0xff] }
  0xe5   :  { %1093 = vmatprep.subr.msk.mxu1 %vm118_vm0, %v378_v48  ;;  %v367_v45 = vmul.f32 %v347_v38, %v327_v35  ;;  %v612_v48 = vld [vmem:[%s1931_s13 + $0x1f8] sm:$0xff]  ;;  %1135 = vmatprep.subr.mxu0 %v567_v0  ;;  %v581_v12 = vld [vmem:[%s1931_s13 + $0x100] sm:$0xff]  ;;  %v768_v35 = vld [vmem:[%s1934_s2 + $0x30] sm:$0xff] }
  0xe6   :  { %1094 = vmatpush1.msk.msra.mxu1 %vm118_vm0, %v377_v52  ;;  %v610_v52 = vld [vmem:[%s1931_s13 + $0x1e8] sm:$0xff]  ;;  %1136 = vmatpush3.msra.mxu0 %v551_v2  ;;  %v584_v24 = vld [vmem:[%s1931_s13 + $0x118] sm:$0xff]  ;;  %v770_v33 = vld [vmem:[%s1934_s2 + $0x40] sm:$0xff] }
  0xe7   :  { %427 = vmatprep.subr.mxu1 %v374_v55  ;;  %v593_v55 = vld [vmem:[%s1931_s13 + $0x160] sm:$0xff]  ;;  %1137 = vmatprep.subr.mxu0 %v566_v5  ;;  %v767_v37 = vld [vmem:[%s1934_s2 + $0x28] sm:$0xff]  ;;  %v764_v43 = vld [vmem:[%s1934_s2 + $0x10] sm:$0xff] }
  0xe8   :  { %428 = vmatpush1.msra.mxu1 %v373_v59  ;;  %v591_v59 = vld [vmem:[%s1931_s13 + $0x150] sm:$0xff] }
  0xe9   :  { %429 = vmatprep.subr.mxu1 %v370_v63  ;;  %v605_v63 = vld [vmem:[%s1931_s13 + $0x1c0] sm:$0xff] }
  0xea   :  { %430 = vmatpush1.msra.mxu1 %v369_v4  ;;  %v604_v4 = vld [vmem:[%s1931_s13 + $0x1b8] sm:$0xff] }
  0xeb   :  { %431 = vmatprep.subr.mxu1 %v366_v9  ;;  %v550_v9 = vld [vmem:[%s1931_s13 + $0x8] sm:$0xff] }
  0xec   :  { %432 = vmatpush1.msra.mxu1 %v365_v15  ;;  %1138 = vmatpush3.msra.mxu0 %v550_v9  ;;  %v587_v15 = vld [vmem:[%s1931_s13 + $0x130] sm:$0xff] }
  0xed   :  { %433 = vmatprep.subr.mxu1 %v362_v22  ;;  %1139 = vmatprep.subr.mxu0 %v565_v13  ;;  %v601_v22 = vld [vmem:[%s1931_s13 + $0x1a0] sm:$0xff] }
  0xee   :  { %434 = vmatpush1.msra.mxu1 %v361_v17  ;;  %1140 = vmatpush3.msra.mxu0 %v549_v16  ;;  %v599_v17 = vld [vmem:[%s1931_s13 + $0x190] sm:$0xff] }
  0xef   :  { %1095 = vmatmul.mubr.msk.f32.vlgmr.msra.gmra.mxu1 %vm102_vm1, %v381_v20  ;;  %1096 = vmatprep.subr.msk.mxu1 %vm118_vm0, %v380_v29 }
  0xf0   :  { %1097 = vmatpush1.msk.msra.mxu1 %vm118_vm0, %v379_v32  ;;  %538 = vmatprep.mubr.f32.mxu1 %v1278_v3 }
  0xf1   :  { %498 = vmatprep.subr.mxu1 %v376_v34  ;;  %1207 = vmatprep.subr.mxu0 %v1278_v3 }
  0xf2   :  { %499 = vmatpush1.msra.mxu1 %v375_v36 }
  0xf3   :  { %500 = vmatprep.subr.mxu1 %v372_v39  ;;  %v766_v39 = vld [vmem:[%s1934_s2 + $0x20] sm:$0xff] }
  0xf4   :  { %501 = vmatpush1.msra.mxu1 %v371_v42  ;;  %v765_v42 = vld [vmem:[%s1934_s2 + $0x18] sm:$0xff] }
  0xf5   :  { %502 = vmatprep.subr.mxu1 %v368_v44  ;;  %v763_v44 = vld [vmem:[%s1934_s2 + $0x8] sm:$0xff] }
  0xf6   :  { %503 = vmatpush1.msra.mxu1 %v367_v45  ;;  %v762_v45 = vld [vmem:[%s1934_s2] sm:$0xff] }
  0xf7   :  { %504 = vmatprep.subr.mxu1 %v364_v46  ;;  %v753_v46 = vld [vmem:[%s1935_s7] sm:$0xff] }
  0xf8   :  { %505 = vmatpush1.msra.mxu1 %v363_v47  ;;  %v754_v47 = vld [vmem:[%s1935_s7 + $0x8] sm:$0xff] }
  0xf9   :  { %1098 = vmatmul.mubr.msk.f32.vlgmr.msra.gmra.mxu1 %vm102_vm1, %v381_v20  ;;  %1144 = vmatprep.subr.mxu1 %v612_v48  ;;  %v597_v20 = vld [vmem:[%s1931_s13 + $0x180] sm:$0xff]  ;;  %v755_v48 = vld [vmem:[%s1935_s7 + $0x10] sm:$0xff] }
  0xfa   :  { %1145 = vmatpush3.msra.mxu1 %v596_v49  ;;  %v756_v49 = vld [vmem:[%s1935_s7 + $0x18] sm:$0xff] }
  0xfb   :  { %1146 = vmatprep.subr.mxu1 %v611_v50  ;;  %v757_v50 = vld [vmem:[%s1935_s7 + $0x20] sm:$0xff] }
  0xfc   :  { %1147 = vmatpush3.msra.mxu1 %v595_v51  ;;  %v758_v51 = vld [vmem:[%s1935_s7 + $0x28] sm:$0xff] }
  0xfd   :  { %1148 = vmatprep.subr.mxu1 %v610_v52  ;;  %v759_v52 = vld [vmem:[%s1935_s7 + $0x30] sm:$0xff] }
  0xfe   :  { %1149 = vmatpush3.msra.mxu1 %v594_v53  ;;  %v760_v53 = vld [vmem:[%s1935_s7 + $0x38] sm:$0xff] }
  0xff   :  { %1150 = vmatprep.subr.mxu1 %v609_v54  ;;  %v761_v54 = vld [vmem:[%s1935_s7 + $0x40] sm:$0xff] }
 0x100   :  { %1151 = vmatpush3.msra.mxu1 %v593_v55  ;;  %v1071_v55 = vld [vmem:[%s1936_s0] sm:$0xff] }
 0x101   :  { %1152 = vmatprep.subr.mxu1 %v608_v56  ;;  %1072 = vst [vmem:[%s1937_s14] sm:$0xff] %v1071_v55 }
 0x102   :  { %1153 = vmatpush3.msra.mxu1 %v592_v57 }
 0x103   :  { %1154 = vmatprep.subr.mxu1 %v607_v58 }
 0x104   :  { %1155 = vmatpush3.msra.mxu1 %v591_v59 }
 0x105   :  { %1156 = vmatprep.subr.mxu1 %v606_v60 }
 0x106   :  { %1157 = vmatpush3.msra.mxu1 %v590_v61 }
 0x107   :  { %1158 = vmatprep.subr.mxu1 %v605_v63 }
 0x108   :  { %1159 = vmatpush3.msra.mxu1 %v589_v1 }
 0x109   :  { %1160 = vmatprep.subr.mxu1 %v604_v4 }
 0x10a   :  { %1161 = vmatpush3.msra.mxu1 %v588_v7 }
 0x10b   :  { %1162 = vmatprep.subr.mxu1 %v603_v11 }
 0x10c   :  { %1163 = vmatpush3.msra.mxu1 %v587_v15  ;;  %v823_v15 = vpop.permute.xlu0 %822 }
 0x10d   :  { %1164 = vmatprep.subr.mxu1 %v602_v18 }
 0x10e   :  { %1165 = vmatpush3.msra.mxu1 %v586_v21  ;;  %v818_v21 = vpop.permute.xlu1 %817 }
 0x10f   :  { %1166 = vmatprep.subr.mxu1 %v601_v22 }
 0x110   :  { %1167 = vmatpush3.msra.mxu1 %v585_v19  ;;  %v813_v19 = vpop.permute.xlu0 %812 }
 0x111   :  { %1168 = vmatprep.subr.mxu1 %v600_v23 }
 0x112   :  { %1169 = vmatpush3.msra.mxu1 %v584_v24 }
 0x113   :  { %1170 = vmatprep.subr.mxu1 %v599_v17  ;;  %v808_v17 = vpop.permute.xlu1 %807 }
 0x114   :  { %1171 = vmatpush3.msra.mxu1 %v583_v25 }
 0x115   :  { %1172 = vmatprep.subr.mxu1 %v598_v26 }
 0x116   :  { %1173 = vmatpush3.msra.mxu1 %v582_v14  ;;  %v803_v14 = vpop.permute.xlu0 %802 }
 0x117   :  { %1174 = vmatprep.subr.mxu1 %v597_v20 }
 0x118   :  { %1175 = vmatpush3.msra.mxu1 %v581_v12 }
 0x119   :  { %1252 = vmatprep.subr.mxu1 %v1278_v3 }
 0x1af   :  { %v469_v27 = vpop.f32.mrf.mxu1 }
 0x1b0   :  { %v470_v29 = vadd.f32 %v469_v27, %v386_v28 }
 0x1b1   :  { %v471_v10 = vpop.f32.mrf.mxu1 }
 0x1b2   :  { %v472_v30 = vadd.f32 %v471_v10, %v386_v28  ;;  %v545_v32 = vmax.f32 %v470_v29, 0.0 }
 0x1b4   :  { %v546_v31 = vmax.f32 %v472_v30, 0.0 }
 0x1b6   :  { %677 = vmatprep.mubr.f32.mxu0 %v546_v31 }
 0x1b7   :  { %678 = vmatmul.mubr.f32.vlgmr.msra.gmra.mxu0 %v545_v32  ;;  %v798_v32 = vpop.permute.xlu1 %797 }
 0x1b8   :  { %1208 = vmatpush3.msra.mxu0 %v770_v33  ;;  %1225 = vmatprep.mubr.msk.f32.mxu0 %vm1280_vm2, %v1278_v3  ;;  %v979_v33 = vld [vmem:[%s1938_s12 + $0x38] sm:$0xff] }
 0x1b9   :  { %1209 = vmatprep.subr.mxu0 %v1278_v3  ;;  %v540_v34 = vpop.f32.mrf.mxu1 }
 0x1ba   :  { %1210 = vmatpush3.msra.mxu0 %v769_v8  ;;  %v541_v6 = vadd.f32 %v540_v34, %v386_v28 }
 0x1bb   :  { %1211 = vmatprep.subr.mxu0 %v1278_v3  ;;  %v542_v36 = vpop.f32.mrf.mxu1 }
 0x1bc   :  { %v543_v38 = vadd.f32 %v542_v36, %v386_v28  ;;  %1212 = vmatpush3.msra.mxu0 %v768_v35  ;;  %v547_v41 = vmax.f32 %v541_v6, 0.0  ;;  %v980_v28 = vld [vmem:[%s1938_s12 + $0x40] sm:$0xff]  ;;  %v793_v6 = vpop.permute.xlu0 %792  ;;  %v978_v36 = vld [vmem:[%s1938_s12 + $0x30] sm:$0xff] }
 0x1bd   :  { %1213 = vmatprep.subr.mxu0 %v1278_v3 }
 0x1be   :  { %v548_v40 = vmax.f32 %v543_v38, 0.0  ;;  %1214 = vmatpush3.msra.mxu0 %v767_v37 }
 0x1bf   :  { %1215 = vmatprep.subr.mxu0 %v1278_v3 }
 0x1c0   :  { %1216 = vmatpush3.msra.mxu0 %v766_v39  ;;  %747 = vmatprep.mubr.f32.mxu1 %v548_v40  ;;  %v977_v40 = vld [vmem:[%s1938_s12 + $0x28] sm:$0xff] }
 0x1c1   :  { %1217 = vmatprep.subr.mxu0 %v1278_v3  ;;  %748 = vmatmul.mubr.f32.vlgmr.msra.gmra.mxu1 %v547_v41 }
 0x1c2   :  { %1218 = vmatpush3.msra.mxu0 %v765_v42  ;;  %1270 = vmatprep.mubr.msk.f32.mxu1 %vm1280_vm2, %v1278_v3 }
 0x1c3   :  { %1219 = vmatprep.subr.mxu0 %v1278_v3 }
 0x1c4   :  { %1220 = vmatpush3.msra.mxu0 %v764_v43 }
 0x1c5   :  { %1221 = vmatprep.subr.mxu0 %v1278_v3 }
 0x1c6   :  { %1222 = vmatpush3.msra.mxu0 %v763_v44  ;;  %v788_v44 = vpop.permute.xlu1 %787 }
 0x1c7   :  { %1223 = vmatprep.subr.mxu0 %v1278_v3 }
 0x1c8   :  { %1224 = vmatpush3.msra.mxu0 %v762_v45  ;;  %v976_v45 = vld [vmem:[%s1938_s12 + $0x20] sm:$0xff] }
 0x1c9   :  { %1226 = vmatmul.mubr.msk.f32.vlgmr.msra.gmra.mxu0 %vm825_vm3, %v753_v46 }
 0x1ca   :  { %1228 = vmatprep.mubr.msk.f32.mxu0 %vm1280_vm2, %v1278_v3 }
 0x1cd   :  { %1229 = vmatmul.mubr.msk.f32.gmra.mxu0 %vm825_vm3, %v754_v47 }
 0x1ce   :  { %1231 = vmatprep.mubr.msk.f32.mxu0 %vm1280_vm2, %v1278_v3 }
 0x1d1   :  { %1232 = vmatmul.mubr.msk.f32.gmra.mxu0 %vm825_vm3, %v755_v48 }
 0x1d2   :  { %1234 = vmatprep.mubr.msk.f32.mxu0 %vm1280_vm2, %v1278_v3 }
 0x1d5   :  { %1235 = vmatmul.mubr.msk.f32.gmra.mxu0 %vm825_vm3, %v756_v49  ;;  %v783_v49 = vpop.permute.xlu0 %782 }
 0x1d6   :  { %1237 = vmatprep.mubr.msk.f32.mxu0 %vm1280_vm2, %v1278_v3 }
 0x1d9   :  { %1238 = vmatmul.mubr.msk.f32.gmra.mxu0 %vm825_vm3, %v757_v50  ;;  %v975_v50 = vld [vmem:[%s1938_s12 + $0x18] sm:$0xff] }
 0x1da   :  { %1240 = vmatprep.mubr.msk.f32.mxu0 %vm1280_vm2, %v1278_v3 }
 0x1dd   :  { %1241 = vmatmul.mubr.msk.f32.gmra.mxu0 %vm825_vm3, %v758_v51 }
 0x1de   :  { %1243 = vmatprep.mubr.msk.f32.mxu0 %vm1280_vm2, %v1278_v3 }
 0x1e1   :  { %1244 = vmatmul.mubr.msk.f32.gmra.mxu0 %vm825_vm3, %v759_v52 }
 0x1e2   :  { %1246 = vmatprep.mubr.msk.f32.mxu0 %vm1280_vm2, %v1278_v3 }
 0x1e5   :  { %1247 = vmatmul.mubr.msk.f32.gmra.mxu0 %vm825_vm3, %v760_v53 }
 0x1e6   :  { %1249 = vmatprep.mubr.msk.f32.mxu0 %vm1280_vm2, %v1278_v3 }
 0x1e9   :  { %1250 = vmatmul.mubr.msk.f32.gmra.mxu0 %vm825_vm3, %v761_v54  ;;  %v974_v54 = vld [vmem:[%s1938_s12 + $0x10] sm:$0xff] }
 0x277   :  { %v1141_v56 = vpop.f32.mrf.mxu0 }
 0x279   :  { %v1142_v57 = vpop.f32.mrf.mxu0 }
 0x27a   :  { %v1143_v60 = vadd.f32 %v1142_v57, %v1141_v56  ;;  %v973_v57 = vld [vmem:[%s1938_s12 + $0x8] sm:$0xff] }
 0x281   :  { %v1176_v58 = vpop.f32.mrf.mxu1 }
 0x283   :  { %v1177_v59 = vpop.f32.mrf.mxu1 }
 0x284   :  { %v1178_v61 = vadd.f32 %v1177_v59, %v1176_v58 }
 0x286   :  { %v750_v62 = vadd.f32 %v1178_v61, %v1143_v60  ;;  %v972_v60 = vld [vmem:[%s1938_s12] sm:$0xff] }
 0x288   :  { %1073 = vst [vmem:[%s1937_s14 + $0x8] sm:$0xf] %v750_v62 }
 0x289   :  { %v919_v63 = vpop.f32.mrf.mxu0 }
 0x28a   :  { %v920_v51 = vadd.f32 %v919_v63, %v783_v49  ;;  %v990_v63 = vld [vmem:[%s1939_s9] sm:$0xf] }
 0x28b   :  { %v1227_v0 = vpop.f32.mrf.mxu0 }
 0x28c   :  { %v963_v58 = vmax.f32 %v920_v51, 0.0  ;;  %v995_v0 = vpop.permute.xlu1 %994 }
 0x28d   :  { %v924_v1 = vpop.f32.mrf.mxu0 }
 0x28e   :  { %v925_v46 = vadd.f32 %v924_v1, %v788_v44  ;;  %v981_v62 = vmul.f32 %v972_v60, %v963_v58 }
 0x28f   :  { %v1230_v2 = vpop.f32.mrf.mxu0 }
 0x290   :  { %v964_v55 = vmax.f32 %v925_v46, 0.0 }
 0x291   :  { %v929_v4 = vpop.f32.mrf.mxu0 }
 0x292   :  { %v930_v41 = vadd.f32 %v929_v4, %v793_v6  ;;  %v982_v61 = vmul.f32 %v973_v57, %v964_v55 }
 0x293   :  { %v1233_v5 = vpop.f32.mrf.mxu0 }
 0x294   :  { %v965_v52 = vmax.f32 %v930_v41, 0.0 }
 0x295   :  { %v934_v7 = vpop.f32.mrf.mxu0 }
 0x296   :  { %v935_v37 = vadd.f32 %v934_v7, %v798_v32  ;;  %v983_v59 = vmul.f32 %v974_v54, %v965_v52 }
 0x297   :  { %v1236_v9 = vpop.f32.mrf.mxu0 }
 0x298   :  { %v966_v47 = vmax.f32 %v935_v37, 0.0 }
 0x299   :  { %v939_v11 = vpop.f32.mrf.mxu0 }
 0x29a   :  { %v940_v8 = vadd.f32 %v939_v11, %v803_v14  ;;  %v984_v56 = vmul.f32 %v975_v50, %v966_v47 }
 0x29b   :  { %v1239_v13 = vpop.f32.mrf.mxu0 }
 0x29c   :  { %v967_v42 = vmax.f32 %v940_v8, 0.0 }
 0x29d   :  { %v944_v16 = vpop.f32.mrf.mxu0 }
 0x29e   :  { %v945_v10 = vadd.f32 %v944_v16, %v808_v17  ;;  %v985_v53 = vmul.f32 %v976_v45, %v967_v42 }
 0x29f   :  { %v1242_v18 = vpop.f32.mrf.mxu0 }
 0x2a0   :  { %v968_v38 = vmax.f32 %v945_v10, 0.0 }
 0x2a1   :  { %v949_v22 = vpop.f32.mrf.mxu0 }
 0x2a2   :  { %v950_v12 = vadd.f32 %v949_v22, %v813_v19  ;;  %v986_v48 = vmul.f32 %v977_v40, %v968_v38 }
 0x2a3   :  { %v1245_v23 = vpop.f32.mrf.mxu0 }
 0x2a4   :  { %v969_v34 = vmax.f32 %v950_v12, 0.0 }
 0x2a5   :  { %v954_v24 = vpop.f32.mrf.mxu0 }
 0x2a6   :  { %v955_v26 = vadd.f32 %v954_v24, %v818_v21  ;;  %v987_v43 = vmul.f32 %v978_v36, %v969_v34 }
 0x2a7   :  { %v1248_v25 = vpop.f32.mrf.mxu0 }
 0x2a8   :  { %v970_v30 = vmax.f32 %v955_v26, 0.0 }
 0x2a9   :  { %v959_v20 = vpop.f32.mrf.mxu0 }
 0x2aa   :  { %v960_v27 = vadd.f32 %v959_v20, %v823_v15  ;;  %v988_v39 = vmul.f32 %v979_v33, %v970_v30 }
 0x2ab   :  { %v1251_v29 = vpop.f32.mrf.mxu0 }
 0x2ac   :  { %v971_v31 = vmax.f32 %v960_v27, 0.0 }
 0x2ae   :  { %v989_v35 = vmul.f32 %v980_v28, %v971_v31 }
 0x2b0   :  { %1253 = vmatpush3.msra.mxu1 %v989_v35 }
 0x2b1   :  { %1254 = vmatprep.subr.mxu1 %v1278_v3 }
 0x2b2   :  { %1255 = vmatpush3.msra.mxu1 %v988_v39 }
 0x2b3   :  { %1256 = vmatprep.subr.mxu1 %v1278_v3 }
 0x2b4   :  { %1257 = vmatpush3.msra.mxu1 %v987_v43 }
 0x2b5   :  { %1258 = vmatprep.subr.mxu1 %v1278_v3 }
 0x2b6   :  { %1259 = vmatpush3.msra.mxu1 %v986_v48 }
 0x2b7   :  { %1260 = vmatprep.subr.mxu1 %v1278_v3 }
 0x2b8   :  { %1261 = vmatpush3.msra.mxu1 %v985_v53 }
 0x2b9   :  { %1262 = vmatprep.subr.mxu1 %v1278_v3 }
 0x2ba   :  { %1263 = vmatpush3.msra.mxu1 %v984_v56 }
 0x2bb   :  { %1264 = vmatprep.subr.mxu1 %v1278_v3 }
 0x2bc   :  { %1265 = vmatpush3.msra.mxu1 %v983_v59 }
 0x2bd   :  { %1266 = vmatprep.subr.mxu1 %v1278_v3 }
 0x2be   :  { %1267 = vmatpush3.msra.mxu1 %v982_v61 }
 0x2bf   :  { %1268 = vmatprep.subr.mxu1 %v1278_v3 }
 0x2c0   :  { %1269 = vmatpush3.msra.mxu1 %v981_v62 }
 0x2c1   :  { %1271 = vmatmul.mubr.msk.f32.vlgmr.msra.gmra.mxu1 %vm825_vm3, %v990_v63 }
 0x381   :  { %v1066_v1 = vpop.f32.mrf.mxu1 }
 0x382   :  { %v1067_v2 = vadd.f32 %v1066_v1, %v995_v0 }
 0x383   :  { %v1272_v4 = vpop.f32.mrf.mxu1 }
 0x384   :  { %v1070_v5 = vmax.f32 %v1067_v2, 0.0 }
 0x386   :  { %1074 = vst [vmem:[%s1937_s14 + $0xc] sm:$0xf] %v1070_v5 }

</bundles_post_ra>
